<compile_context>
chip_gen: v6e
topology: v6e:2x2x1
jax: 0.10.0
libtpu: 0.0.40
codegen_flags: <defaults>
</compile_context>

<pallas_src>
import functools

import jax
import jax.numpy as jnp
from jax import lax
from jax.experimental import pallas as pl
from jax.experimental.pallas import tpu as pltpu


def _int_pow(x, e):
    """x ** e for static integer e >= 1 via exponentiation by squaring."""
    result = None
    cur = x
    while True:
        if e & 1:
            result = cur if result is None else result * cur
        e >>= 1
        if e == 0:
            return result
        cur = cur * cur


def _focal_loss_kernel(x_ref, t_ref, *out_refs, gamma, alpha, ignore_index,
                       hw, s_tile, blocks_per_p, need_cnt, need_pos_mask):
    """Processes one (1, C, s_tile, 128) logits tile.

    x_ref   : (1, C, S, 128) logits in native dtype (cast per-class to f32)
    t_ref   : (1, S, 128)    targets (int8 / int16 / int32)
    out[0]  : (1, 1, 8, 128) f32 loss accumulator, resident over the j axis
    out[1]  : (1, 1, 8, 128) f32 valid-count accumulator (only if need_cnt)
    """
    sum_ref = out_refs[0]
    cnt_ref = out_refs[1] if need_cnt else None

    j = pl.program_id(2)

    @pl.when(j == 0)
    def _init():
        sum_ref[...] = jnp.zeros_like(sum_ref)
        if need_cnt:
            cnt_ref[...] = jnp.zeros_like(cnt_ref)

    C = x_ref.shape[1]
    S = s_tile
    tgt = t_ref[0].astype(jnp.int32)                      # (S, 128)

    def xc(c):
        return x_ref[0, c].astype(jnp.float32)            # (S, 128)

    # Class reductions as elementwise VPU ops across C lane+sublane-dense slabs
    # (static unroll over C; fine for the usual C of up to a few hundred).
    m = xc(0)
    for c in range(1, C):
        m = jnp.maximum(m, xc(c))

    se = jnp.zeros_like(m)
    x_t = jnp.zeros_like(m)
    at = jnp.zeros_like(m) if alpha is not None else None
    for c in range(C):
        v = xc(c)
        se = se + jnp.exp(v - m)
        hit = tgt == c
        x_t = jnp.where(hit, v, x_t)
        if alpha is not None:
            at = jnp.where(hit, alpha[c], at)

    # logpt = log_softmax(x)[target] without materializing the full log-softmax.
    logpt = x_t - m - jnp.log(se)
    pt = jnp.exp(logpt)
    logpt_w = logpt * at if alpha is not None else logpt

    g = float(gamma)
    if g == 0.0:
        loss = -logpt_w
    elif g.is_integer() and 1.0 <= g <= 64.0:
        loss = -(_int_pow(1.0 - pt, int(g)) * logpt_w)     # square-and-multiply
    else:
        # Non-integer gamma: one extra exp+log round-trip on the single EUP slot.
        base = jnp.maximum(1.0 - pt, 0.0)
        loss = -(jnp.exp(g * jnp.log(base)) * logpt_w)

    # Validity: only built when statically needed (tail / OOB tiles or
    # ignore_index). Select with where() so garbage lanes cannot poison the sum.
    valid = None
    if need_pos_mask:
        row = lax.broadcasted_iota(jnp.int32, (S, 128), 0)
        col = lax.broadcasted_iota(jnp.int32, (S, 128), 1)
        sb = pl.program_id(1) * blocks_per_p + j           # logical (unclamped)
        pos = (sb * s_tile + row) * 128 + col
        valid = pos < hw
    if ignore_index is not None:
        keep = tgt != ignore_index
        valid = keep if valid is None else jnp.logical_and(valid, keep)
    if valid is not None:
        loss = jnp.where(valid, loss, 0.0)

    def acc(ref, vals):
        if S >= 8 and S % 8 == 0:
            # Fold the tile to (8,128) with VPU adds and add into the resident block.
            ref[0, 0] += vals.reshape(S // 8, 8, 128).sum(axis=0)
        else:  # S equals the (small) full extent < 8
            ref[0, 0, :S, :] += vals

    acc(sum_ref, loss)
    if need_cnt:
        acc(cnt_ref, valid.astype(jnp.float32))


def focal_loss(logits, target, *, gamma=0, alpha=None, size_average=True,
               ignore_index=None):
    """Pallas TPU focal loss matching FocalLoss.forward.

    logits: (N, C, *spatial) float (any float dtype, read natively) or (M, C).
    target: (N, *spatial) int (or (M,) for 2-D logits).
    """
    if logits.ndim == 2:
        # TODO(synk): the flat (M, C) path still pays one HBM transpose; an
        # MXU-native (TILE_M, C) kernel variant would keep it read-once.
        x3 = jnp.transpose(logits)[None]                   # (1, C, M)
        t3 = jnp.reshape(target, (1, -1))
    else:
        n, c = logits.shape[0], logits.shape[1]
        x3 = logits.reshape(n, c, -1)                      # free reshape (NCHW contiguous)
        t3 = target.reshape(n, -1)
    N, C, HW = x3.shape

    # alpha is a module-construction constant -> bake it in statically.
    if alpha is None:
        alpha_t = None
    elif isinstance(alpha, (float, int)):
        alpha_t = (float(alpha), 1.0 - float(alpha))
    else:
        alpha_t = tuple(float(a) for a in list(alpha))
    if alpha_t is not None and len(alpha_t) != C:
        raise ValueError(
            f"alpha has {len(alpha_t)} entries but logits have C={C} classes")

    # Lane-pad positions to a multiple of 128, then go 4-D so classes sit on a
    # non-minor axis: (N, C, S_rows, 128) / (N, S_rows, 128).
    HW_pad = pl.cdiv(HW, 128) * 128
    if HW_pad != HW:
        x3 = jnp.pad(x3, ((0, 0), (0, 0), (0, HW_pad - HW)))
        t3 = jnp.pad(t3, ((0, 0), (0, HW_pad - HW)))
    S_rows = HW_pad // 128

    # Tile: ~2 MiB of f32 class-stack per step (input block + the few
    # (s_tile,128) f32 temporaries stay small) while still amortizing the
    # ~0.35us per-step overhead.
    target_rows = max(8, (2 * 1024 * 1024) // (C * 128 * 4))
    target_rows = min(target_rows, 1024)
    if S_rows <= target_rows:
        s_tile = S_rows
        if N == 1 and S_rows >= 16:
            # Split the spatial axis so v7x's second TensorCore gets work.
            s_tile = max(8, (((S_rows + 1) // 2) // 8) * 8)
    else:
        s_tile = max(8, (target_rows // 8) * 8)

    num_sb = pl.cdiv(S_rows, s_tile)
    P = 2 if (N == 1 and num_sb >= 2) else 1
    J = pl.cdiv(num_sb, P)

    need_pos_mask = (HW_pad != HW) or (num_sb * s_tile != S_rows) or (P * J != num_sb)
    need_cnt = (ignore_index is not None) and size_average

    # Narrow target dtype when the value range fits and the packed layout is
    # natively tiled (cuts target HBM traffic 4x / 2x on bandwidth-bound shapes).
    lo = 0 if ignore_index is None else min(0, int(ignore_index))
    hi = (C - 1) if ignore_index is None else max(C - 1, int(ignore_index))
    if s_tile % 32 == 0 and lo >= -128 and hi <= 127:
        tdtype = jnp.int8
    elif s_tile % 16 == 0 and lo >= -32768 and hi <= 32767:
        tdtype = jnp.int16
    else:
        tdtype = jnp.int32

    x4 = x3.reshape(N, C, S_rows, 128)
    t4 = t3.reshape(N, S_rows, 128).astype(tdtype)

    if P * J == num_sb:
        sblk = lambda p, j: p * J + j
    else:
        last = num_sb - 1
        sblk = lambda p, j: jnp.minimum(p * J + j, last)   # OOB steps masked in-kernel

    in_specs = [
        pl.BlockSpec((1, C, s_tile, 128), lambda n, p, j: (n, 0, sblk(p, j), 0)),
        pl.BlockSpec((1, s_tile, 128), lambda n, p, j: (n, sblk(p, j), 0)),
    ]
    out_shape = [jax.ShapeDtypeStruct((N, P, 8, 128), jnp.float32)]
    out_specs = [pl.BlockSpec((1, 1, 8, 128), lambda n, p, j: (n, p, 0, 0))]
    if need_cnt:
        out_shape.append(jax.ShapeDtypeStruct((N, P, 8, 128), jnp.float32))
        out_specs.append(pl.BlockSpec((1, 1, 8, 128), lambda n, p, j: (n, p, 0, 0)))

    # VMEM budget: double-buffered blocks + in-kernel f32 temporaries, 2x
    # headroom, capped at 75% of physical per-core VMEM (v7x only has 64 MiB).
    in_bytes = jnp.dtype(logits.dtype).itemsize
    est = (2 * C * s_tile * 128 * in_bytes
           + 2 * s_tile * 128 * jnp.dtype(tdtype).itemsize
           + 2 * len(out_shape) * 8 * 128 * 4
           + 8 * s_tile * 128 * 4)
    try:
        phys = int(getattr(pltpu.get_tpu_info(), "vmem_capacity_bytes",
                           64 * 1024 * 1024))
    except Exception:
        phys = 64 * 1024 * 1024
    vmem_limit = int(min(max(2 * est, 16 * 1024 * 1024), (phys * 3) // 4))

    kernel = functools.partial(
        _focal_loss_kernel,
        gamma=float(gamma), alpha=alpha_t, ignore_index=ignore_index,
        hw=HW, s_tile=s_tile, blocks_per_p=J,
        need_cnt=need_cnt, need_pos_mask=need_pos_mask)

    outs = pl.pallas_call(
        kernel,
        out_shape=tuple(out_shape),
        grid_spec=pltpu.PrefetchScalarGridSpec(
            num_scalar_prefetch=0,
            grid=(N, P, J),
            in_specs=in_specs,
            out_specs=tuple(out_specs)),
        compiler_params=pltpu.CompilerParams(
            dimension_semantics=("parallel", "parallel", "arbitrary"),
            vmem_limit_bytes=vmem_limit),
    )(x4, t4)

    # Tiny final reduction of the (N, P, 8, 128) partials in plain JAX.
    total = jnp.sum(outs[0])
    if size_average:
        if ignore_index is None:
            return total / float(N * HW)                   # static denominator
        cnt = jnp.sum(outs[1])
        # Guard the all-ignored degenerate case (torch would NaN on empty mean).
        return total / jnp.maximum(cnt, 1.0)
    return total


def focal_loss_ref(logits, target, *, gamma=0, alpha=None, size_average=True,
                   ignore_index=None):
    """Pure-JAX reference mirroring the torch forward, for correctness check."""
    N, C = logits.shape[0], logits.shape[1]
    x = logits.reshape(N, C, -1).transpose(0, 2, 1).reshape(-1, C).astype(jnp.float32)
    t = target.reshape(-1).astype(jnp.int32)
    if ignore_index is not None:
        keep = t != ignore_index
        x = x[keep]
        t = t[keep]
    logsm = jax.nn.log_softmax(x, axis=-1)
    logpt = jnp.take_along_axis(logsm, t[:, None], axis=1)[:, 0]
    pt = jnp.exp(logpt)
    if alpha is not None:
        if isinstance(alpha, (float, int)):
            alpha_vec = jnp.array([float(alpha), 1.0 - float(alpha)], jnp.float32)
        else:
            alpha_vec = jnp.asarray(alpha, jnp.float32)
        logpt = logpt * alpha_vec[t]
    loss = -1.0 * (1.0 - pt) ** gamma * logpt
    return loss.mean() if size_average else loss.sum()


if __name__ == "__main__":
    key = jax.random.PRNGKey(0)
    k_logits, k_target = jax.random.split(key)

    N, C, H, W = 2, 4, 16, 16
    logits = jax.random.normal(k_logits, (N, C, H, W), dtype=jnp.float32)
    target = jax.random.randint(k_target, (N, H, W), 0, C, dtype=jnp.int32)

    # Case 1: per-class alpha list, gamma=2, mean reduction.
    out1 = jax.block_until_ready(
        focal_loss(logits, target, gamma=2.0, alpha=[0.1, 0.2, 0.3, 0.4],
                   size_average=True))
    ref1 = jax.block_until_ready(
        focal_loss_ref(logits, target, gamma=2.0, alpha=[0.1, 0.2, 0.3, 0.4],
                       size_average=True))
    assert jnp.allclose(out1, ref1, rtol=1e-5, atol=1e-5), (out1, ref1)

    # Case 2: no alpha, gamma=0, sum reduction, ignore_index masking.
    out2 = jax.block_until_ready(
        focal_loss(logits, target, gamma=0.0, alpha=None, size_average=False,
                   ignore_index=0))
    ref2 = jax.block_until_ready(
        focal_loss_ref(logits, target, gamma=0.0, alpha=None, size_average=False,
                       ignore_index=0))
    assert jnp.allclose(out2, ref2, rtol=1e-5, atol=1e-5), (out2, ref2)

    # Case 3: ignore_index + mean (exercises the count accumulator output).
    out3 = jax.block_until_ready(
        focal_loss(logits, target, gamma=2.0, alpha=None, size_average=True,
                   ignore_index=1))
    ref3 = jax.block_until_ready(
        focal_loss_ref(logits, target, gamma=2.0, alpha=None, size_average=True,
                       ignore_index=1))
    assert jnp.allclose(out3, ref3, rtol=1e-5, atol=1e-5), (out3, ref3)

    # Case 4: flat (M, C) logits, M not a multiple of 128, non-integer gamma.
    M = 100
    logits2 = jax.random.normal(k_logits, (M, C), dtype=jnp.float32)
    target2 = jax.random.randint(k_target, (M,), 0, C, dtype=jnp.int32)
    out4 = jax.block_until_ready(
        focal_loss(logits2, target2, gamma=1.5, alpha=None, size_average=True))
    ref4 = jax.block_until_ready(
        focal_loss_ref(logits2, target2, gamma=1.5, alpha=None, size_average=True))
    assert jnp.allclose(out4, ref4, rtol=1e-5, atol=1e-5), (out4, ref4)

    print("KERNEL_OK")
</pallas_src>

<mosaic_0001>
module attributes {stable_mosaic.version = 11 : i64} {
  func.func @_focal_loss_kernel(%arg0: i32, %arg1: i32, %arg2: i32, %arg3: memref<1x4x2x128xf32, #tpu.memory_space<vmem>>, %arg4: memref<1x2x128xi32, #tpu.memory_space<vmem>>, %arg5: memref<1x1x8x128xf32, #tpu.memory_space<vmem>>) attributes {dimension_semantics = [#tpu.dimension_semantics<parallel>, #tpu.dimension_semantics<parallel>, #tpu.dimension_semantics<arbitrary>], iteration_bounds = array<i64: 2, 1, 1>, scalar_prefetch = 0 : i64, scratch_operands = 0 : i64, tpu.core_type = #tpu.core_type<tc>, window_params = [{transform_indices = @transform_0, window_bounds = array<i64: 1, 4, 2, 128>}, {transform_indices = @transform_1, window_bounds = array<i64: 1, 2, 128>}, {transform_indices = @transform_2, window_bounds = array<i64: 1, 1, 8, 128>}]} {
    %c0_i32 = arith.constant 0 : i32
    %0 = arith.cmpi eq, %arg2, %c0_i32 : i32
    %1 = arith.extui %0 : i1 to i32
    %c0_i32_0 = arith.constant 0 : i32
    %2 = arith.cmpi ne, %1, %c0_i32_0 : i32
    scf.if %2 {
      %cst_49 = arith.constant 0.000000e+00 : f32
      %76 = vector.broadcast %cst_49 : f32 to vector<1x1x8x128xf32>
      %c0_50 = arith.constant 0 : index
      %c0_51 = arith.constant 0 : index
      %c0_52 = arith.constant 0 : index
      %c0_53 = arith.constant 0 : index
      %77 = vector.load %arg5[%c0_50, %c0_51, %c0_52, %c0_53] : memref<1x1x8x128xf32, #tpu.memory_space<vmem>>, vector<1x1x8x128xf32>
      tpu.vector_store %arg5[%c0_50, %c0_51, %c0_52, %c0_53], %76 {strides = array<i32>} : memref<1x1x8x128xf32, #tpu.memory_space<vmem>>, vector<1x1x8x128xf32>,
    } else {
    }
    %c0 = arith.constant 0 : index
    %c0_1 = arith.constant 0 : index
    %c0_2 = arith.constant 0 : index
    %3 = vector.load %arg4[%c0, %c0_1, %c0_2] : memref<1x2x128xi32, #tpu.memory_space<vmem>>, vector<1x2x128xi32>
    %4 = vector.shape_cast %3 : vector<1x2x128xi32> to vector<2x128xi32>
    %c0_3 = arith.constant 0 : index
    %c0_4 = arith.constant 0 : index
    %c0_5 = arith.constant 0 : index
    %c0_6 = arith.constant 0 : index
    %5 = vector.load %arg3[%c0_3, %c0_4, %c0_5, %c0_6] : memref<1x4x2x128xf32, #tpu.memory_space<vmem>>, vector<1x1x2x128xf32>
    %6 = vector.shape_cast %5 : vector<1x1x2x128xf32> to vector<2x128xf32>
    %c0_7 = arith.constant 0 : index
    %c1 = arith.constant 1 : index
    %c0_8 = arith.constant 0 : index
    %c0_9 = arith.constant 0 : index
    %7 = vector.load %arg3[%c0_7, %c1, %c0_8, %c0_9] : memref<1x4x2x128xf32, #tpu.memory_space<vmem>>, vector<1x1x2x128xf32>
    %8 = vector.shape_cast %7 : vector<1x1x2x128xf32> to vector<2x128xf32>
    %9 = arith.maximumf %6, %8 : vector<2x128xf32>
    %c0_10 = arith.constant 0 : index
    %c2 = arith.constant 2 : index
    %c0_11 = arith.constant 0 : index
    %c0_12 = arith.constant 0 : index
    %10 = vector.load %arg3[%c0_10, %c2, %c0_11, %c0_12] : memref<1x4x2x128xf32, #tpu.memory_space<vmem>>, vector<1x1x2x128xf32>
    %11 = vector.shape_cast %10 : vector<1x1x2x128xf32> to vector<2x128xf32>
    %12 = arith.maximumf %9, %11 : vector<2x128xf32>
    %c0_13 = arith.constant 0 : index
    %c3 = arith.constant 3 : index
    %c0_14 = arith.constant 0 : index
    %c0_15 = arith.constant 0 : index
    %13 = vector.load %arg3[%c0_13, %c3, %c0_14, %c0_15] : memref<1x4x2x128xf32, #tpu.memory_space<vmem>>, vector<1x1x2x128xf32>
    %14 = vector.shape_cast %13 : vector<1x1x2x128xf32> to vector<2x128xf32>
    %15 = arith.maximumf %12, %14 : vector<2x128xf32>
    %cst = arith.constant 0.000000e+00 : f32
    %16 = vector.broadcast %cst : f32 to vector<2x128xf32>
    %cst_16 = arith.constant 0.000000e+00 : f32
    %17 = vector.broadcast %cst_16 : f32 to vector<2x128xf32>
    %cst_17 = arith.constant 0.000000e+00 : f32
    %18 = vector.broadcast %cst_17 : f32 to vector<2x128xf32>
    %c0_18 = arith.constant 0 : index
    %c0_19 = arith.constant 0 : index
    %c0_20 = arith.constant 0 : index
    %c0_21 = arith.constant 0 : index
    %19 = vector.load %arg3[%c0_18, %c0_19, %c0_20, %c0_21] : memref<1x4x2x128xf32, #tpu.memory_space<vmem>>, vector<1x1x2x128xf32>
    %20 = vector.shape_cast %19 : vector<1x1x2x128xf32> to vector<2x128xf32>
    %21 = arith.subf %20, %15 : vector<2x128xf32>
    %22 = math.exp %21 : vector<2x128xf32>
    %23 = arith.addf %16, %22 : vector<2x128xf32>
    %c0_i32_22 = arith.constant 0 : i32
    %24 = vector.broadcast %c0_i32_22 : i32 to vector<2x128xi32>
    %25 = arith.cmpi eq, %4, %24 : vector<2x128xi32>
    %26 = arith.select %25, %20, %17 : vector<2x128xi1>, vector<2x128xf32>
    %cst_23 = arith.constant 1.000000e-01 : f32
    %27 = vector.broadcast %cst_23 : f32 to vector<2x128xf32>
    %28 = arith.select %25, %27, %18 : vector<2x128xi1>, vector<2x128xf32>
    %c0_24 = arith.constant 0 : index
    %c1_25 = arith.constant 1 : index
    %c0_26 = arith.constant 0 : index
    %c0_27 = arith.constant 0 : index
    %29 = vector.load %arg3[%c0_24, %c1_25, %c0_26, %c0_27] : memref<1x4x2x128xf32, #tpu.memory_space<vmem>>, vector<1x1x2x128xf32>
    %30 = vector.shape_cast %29 : vector<1x1x2x128xf32> to vector<2x128xf32>
    %31 = arith.subf %30, %15 : vector<2x128xf32>
    %32 = math.exp %31 : vector<2x128xf32>
    %33 = arith.addf %23, %32 : vector<2x128xf32>
    %c1_i32 = arith.constant 1 : i32
    %34 = vector.broadcast %c1_i32 : i32 to vector<2x128xi32>
    %35 = arith.cmpi eq, %4, %34 : vector<2x128xi32>
    %36 = arith.select %35, %30, %26 : vector<2x128xi1>, vector<2x128xf32>
    %cst_28 = arith.constant 2.000000e-01 : f32
    %37 = vector.broadcast %cst_28 : f32 to vector<2x128xf32>
    %38 = arith.select %35, %37, %28 : vector<2x128xi1>, vector<2x128xf32>
    %c0_29 = arith.constant 0 : index
    %c2_30 = arith.constant 2 : index
    %c0_31 = arith.constant 0 : index
    %c0_32 = arith.constant 0 : index
    %39 = vector.load %arg3[%c0_29, %c2_30, %c0_31, %c0_32] : memref<1x4x2x128xf32, #tpu.memory_space<vmem>>, vector<1x1x2x128xf32>
    %40 = vector.shape_cast %39 : vector<1x1x2x128xf32> to vector<2x128xf32>
    %41 = arith.subf %40, %15 : vector<2x128xf32>
    %42 = math.exp %41 : vector<2x128xf32>
    %43 = arith.addf %33, %42 : vector<2x128xf32>
    %c2_i32 = arith.constant 2 : i32
    %44 = vector.broadcast %c2_i32 : i32 to vector<2x128xi32>
    %45 = arith.cmpi eq, %4, %44 : vector<2x128xi32>
    %46 = arith.select %45, %40, %36 : vector<2x128xi1>, vector<2x128xf32>
    %cst_33 = arith.constant 3.000000e-01 : f32
    %47 = vector.broadcast %cst_33 : f32 to vector<2x128xf32>
    %48 = arith.select %45, %47, %38 : vector<2x128xi1>, vector<2x128xf32>
    %c0_34 = arith.constant 0 : index
    %c3_35 = arith.constant 3 : index
    %c0_36 = arith.constant 0 : index
    %c0_37 = arith.constant 0 : index
    %49 = vector.load %arg3[%c0_34, %c3_35, %c0_36, %c0_37] : memref<1x4x2x128xf32, #tpu.memory_space<vmem>>, vector<1x1x2x128xf32>
    %50 = vector.shape_cast %49 : vector<1x1x2x128xf32> to vector<2x128xf32>
    %51 = arith.subf %50, %15 : vector<2x128xf32>
    %52 = math.exp %51 : vector<2x128xf32>
    %53 = arith.addf %43, %52 : vector<2x128xf32>
    %c3_i32 = arith.constant 3 : i32
    %54 = vector.broadcast %c3_i32 : i32 to vector<2x128xi32>
    %55 = arith.cmpi eq, %4, %54 : vector<2x128xi32>
    %56 = arith.select %55, %50, %46 : vector<2x128xi1>, vector<2x128xf32>
    %cst_38 = arith.constant 4.000000e-01 : f32
    %57 = vector.broadcast %cst_38 : f32 to vector<2x128xf32>
    %58 = arith.select %55, %57, %48 : vector<2x128xi1>, vector<2x128xf32>
    %59 = arith.subf %56, %15 : vector<2x128xf32>
    %60 = math.log %53 : vector<2x128xf32>
    %61 = arith.subf %59, %60 : vector<2x128xf32>
    %62 = math.exp %61 : vector<2x128xf32>
    %63 = arith.mulf %61, %58 : vector<2x128xf32>
    %cst_39 = arith.constant 1.000000e+00 : f32
    %64 = vector.broadcast %cst_39 : f32 to vector<2x128xf32>
    %65 = arith.subf %64, %62 : vector<2x128xf32>
    %66 = arith.mulf %65, %65 : vector<2x128xf32>
    %67 = arith.mulf %66, %63 : vector<2x128xf32>
    %cst_40 = arith.constant 0.000000e+00 : f32
    %68 = vector.broadcast %cst_40 : f32 to vector<2x128xf32>
    %69 = arith.subf %68, %67 : vector<2x128xf32>
    %c0_41 = arith.constant 0 : index
    %c0_42 = arith.constant 0 : index
    %c0_43 = arith.constant 0 : index
    %c0_44 = arith.constant 0 : index
    %70 = vector.load %arg5[%c0_41, %c0_42, %c0_43, %c0_44] : memref<1x1x8x128xf32, #tpu.memory_space<vmem>>, vector<1x1x2x128xf32>
    %71 = vector.shape_cast %70 : vector<1x1x2x128xf32> to vector<2x128xf32>
    %72 = arith.addf %71, %69 : vector<2x128xf32>
    %c0_45 = arith.constant 0 : index
    %c0_46 = arith.constant 0 : index
    %c0_47 = arith.constant 0 : index
    %c0_48 = arith.constant 0 : index
    %73 = vector.load %arg5[%c0_45, %c0_46, %c0_47, %c0_48] : memref<1x1x8x128xf32, #tpu.memory_space<vmem>>, vector<1x1x2x128xf32>
    %74 = vector.shape_cast %73 : vector<1x1x2x128xf32> to vector<2x128xf32>
    %75 = vector.shape_cast %72 : vector<2x128xf32> to vector<1x1x2x128xf32>
    tpu.vector_store %arg5[%c0_45, %c0_46, %c0_47, %c0_48], %75 {strides = array<i32>} : memref<1x1x8x128xf32, #tpu.memory_space<vmem>>, vector<1x1x2x128xf32>,
    return
  }
  func.func @transform_0(%arg0: i32, %arg1: i32, %arg2: i32) -> (i32, i32, i32, i32) {
    %c1_i32 = arith.constant 1 : i32
    %0 = arith.muli %arg1, %c1_i32 : i32
    %1 = arith.addi %0, %arg2 : i32
    %c0_i32 = arith.constant 0 : i32
    %c0_i32_0 = arith.constant 0 : i32
    %c0_i32_1 = arith.constant 0 : i32
    return %arg0, %c0_i32, %1, %c0_i32_0 : i32, i32, i32, i32
  }
  func.func @transform_1(%arg0: i32, %arg1: i32, %arg2: i32) -> (i32, i32, i32) {
    %c1_i32 = arith.constant 1 : i32
    %0 = arith.muli %arg1, %c1_i32 : i32
    %1 = arith.addi %0, %arg2 : i32
    %c0_i32 = arith.constant 0 : i32
    %c0_i32_0 = arith.constant 0 : i32
    return %arg0, %1, %c0_i32 : i32, i32, i32
  }
  func.func @transform_2(%arg0: i32, %arg1: i32, %arg2: i32) -> (i32, i32, i32, i32) {
    %c0_i32 = arith.constant 0 : i32
    %c0_i32_0 = arith.constant 0 : i32
    %c0_i32_1 = arith.constant 0 : i32
    return %arg0, %arg1, %c0_i32, %c0_i32_0 : i32, i32, i32, i32
  }
}

</mosaic_0001>

<bundles_post_ra>
// kernel: tpu_custom_call.1
= control target key start
LH: loop header
LB: loop body
LE: loop exit
PB: predicated region body
PF: predicated region fallthrough
CT: control target
= control target key end

     0   :  { %7 = vsyncpa [#allocation3], 0  ;;  %s859_s0 = inlined_call_operand.hbm [shape: f32[2,4,2,128], index: 0, kind: input, shape index: {}]   ;;  %s860_s1 = inlined_call_operand.hbm [shape: s32[2,2,128], index: 1, kind: input, shape index: {}]   ;;  %s861_s2 = inlined_call_operand.hbm [shape: f32[2,1,8,128], index: 2, kind: output, shape index: {}]  }
   0x1   :  { %9 = vsyncpa [#allocation3 + $0x1], 0 }
   0x2   :  { %10 = vsyncpa [#allocation6], 0 }
   0x3   :  { %12 = vsyncpa [#allocation6 + $0x1], 0 }
   0x4   :  { %13 = vsyncpa [#allocation4], 0 }
   0x5   :  { %15 = vsyncpa [#allocation4 + $0x1], 0  ;;  %s683_s9 = smov 0   ;;  %s685_s10 = smov 0  }
   0x6   :  { %s687_s11 = smov 0   ;;  %s689_s12 = smov 0  }
   0x7   :  { %s691_s13 = smov 0   ;;  %s693_s14 = smov 0  }
   0x8 LB: > { %s417_s15 = sadd.s32 4294967295, %s660_s14   ;;  %s418_s16 = sadd.s32 4294967294, %s660_s14   ;;  %s660_s14 = sphi %s693_s14, %s21_s14   ;;  %s656_s13 = sphi %s691_s13, %s873_s13   ;;  %s652_s12 = sphi %s689_s12, %s872_s12   ;;  %s648_s11 = sphi %s687_s11, %s871_s11   ;;  %s644_s10 = sphi %s685_s10, %s870_s10   ;;  %s640_s9 = sphi %s683_s9, %s869_s9  }
   0x9   : > { %s40_s17 = sadd.s32 1, %s656_s13  ;;  %s51_s18 = sadd.s32 1, %s648_s11 }
   0xa   : > { %p42_p0 = scmp.ge.s32.totalorder %s40_s17, 2  ;;  %p58_p1 = scmp.ne.s32.totalorder %s648_s11, %s644_s10 }
   0xb   : > { %p59_p2 = scmp.eq.s32.totalorder %s660_s14, 0  ;;  %p64_p3 = scmp.ne.s32.totalorder %s644_s10, %s640_s9 }
   0xc   : > { %s875_s17 = smov (%p42_p0, %s40_s17), 0  ;;  %p65_p5 = scmp.eq.s32.totalorder %s417_s15, 0 }
   0xd   : > { %p724_p4 = por %p59_p2, %p58_p1  ;;  %s46_s20 = ssub.s32 %s656_s13, %s875_s17 }
   0xe   : > { %p120_p6 = scmp.eq.s32.totalorder %s417_s15, 1  ;;  %p49_p7 = scmp.eq.s32.totalorder %s46_s20, 0 }
   0xf   : > { %p730_p8 = por %p65_p5, %p64_p3  ;;  %p126_p10 = scmp.eq.s32.totalorder %s418_s16, 1 }
  0x10   : > { %p734_p9 = por %p120_p6, %p58_p1  ;;  %p455_p13 = scmp.lt.s32.totalorder %s660_s14, 2 }
  0x11   : > { %s739_s23 = scalar_select %p49_p7, %s648_s11, %s51_s18  }
  0x12   : > { %p741_p11 = por %p126_p10, %p64_p3  ;;  %s748_s25 = sand.u32 1, %s648_s11  }
  0x13   : > { %s421_s26 = sshll.u32 %s748_s25, 3  ;;  %s437_s27 = sshll.u32 %s656_s13, 7 }
  0x14   : > { %s158_s30 = scalar_lea.hbm %s859_s0, %s437_s27  ;;  %s150_s3 = scalar_lea.vmem [#allocation2], %s421_s26 }
  0x15   : > { %s159_s4 = sshll.u32 %s150_s3, 4  ;;  %p757_p0 = pnand %p455_p13, %p724_p4  ;;  %s160_s4 = int_to_ptr.vmem [resolvable:$true] %s159_s4 }
  0x16   : > { %p426_p1 = scmp.ge.s32.totalorder %s660_s14, 1  ;;  %s147_s6 = scalar_lea.sflag [#allocation3], %s748_s25 }
  0x17   : > { %p522_p2 = pneg %p757_p0  ;;  %s533_s7 = scalar_lea.vmem %s160_s4, 128 }
  0x18   : > { %p534_p3 = scmp.ne.s32.totalorder %s160_s4, %s533_s7  ;;  %s662_s8 = smov [#allocation2]  }
  0x19   : > { %s538_s15 = sshll.u32 %s662_s8, 4  ;;  %s539_s15 = int_to_ptr.vmem [resolvable:$false] %s538_s15 }
  0x1a   : > { %p536_p5 = pnand %p534_p3, %p522_p2  ;;  %s540_s16 = scalar_lea.vmem %s539_s15, 256 }
  0x1b   : > { %p541_p4 = scmp.lt.s32.totalorder %s160_s4, %s539_s15  ;;  %p542_p7 = scmp.lt.s32.totalorder %s540_s16, %s533_s7 }
  0x1c   : > { %p537_p6 = pneg %p536_p5 }
  0x1d   : > { %p543_p10 = por %p542_p7, %p541_p4 }
  0x1f   : > { %p544_p13 = pnand %p543_p10, %p537_p6 }
  0x21   : > { %547 = shalt.err (!%p544_p13)
}
  0x22   : > { %s663_s18 = smov 32   ;;  %s664_s19 = smov 2  }
  0x23   : > { %447 = dma.hbm_to_vmem [thread:$0]  (!%p757_p0), %s158_s30, 128, %s160_s4, %s147_s6, %s663_s18, %s663_s18, %s664_s19  }
  0x24   : > { %p187_p3 = scmp.lt.s32.totalorder %s660_s14, 3  ;;  %s424_s20 = sshll.u32 %s748_s25, 1 }
  0x25   : > { %s425_s26 = sshll.u32 %s656_s13, 5  ;;  %s173_s7 = scalar_lea.vmem [#allocation5], %s424_s20 }
  0x26   : > { %p775_p5 = pnand %p426_p1, %p187_p3  ;;  %s180_s3 = scalar_lea.hbm %s860_s1, %s425_s26 }
  0x27   : > { %s182_s8 = sshll.u32 %s173_s7, 4  ;;  %s170_s15 = scalar_lea.sflag [#allocation6], %s748_s25  ;;  %s183_s8 = int_to_ptr.vmem [resolvable:$true] %s182_s8 }
  0x28   : > { %s561_s16 = scalar_lea.vmem %s183_s8, 32  ;;  %s665_s30 = smov [#allocation5]  }
  0x29   : > { %p562_p6 = scmp.ne.s32.totalorder %s183_s8, %s561_s16  ;;  %s566_s4 = sshll.u32 %s665_s30, 4  ;;  %s567_s4 = int_to_ptr.vmem [resolvable:$false] %s566_s4 }
  0x2a   : > { %s568_s6 = scalar_lea.vmem %s567_s4, 64  ;;  %p569_p1 = scmp.lt.s32.totalorder %s183_s8, %s567_s4 }
  0x2b   : > { %p564_p4 = pnand %p562_p6, %p522_p2  ;;  %p570_p10 = scmp.lt.s32.totalorder %s568_s6, %s561_s16 }
  0x2d   : > { %p565_p7 = pneg %p564_p4  ;;  %p571_p13 = por %p570_p10, %p569_p1 }
  0x2f   : > { %p572_p3 = pnand %p571_p13, %p565_p7 }
  0x31   : > { %575 = shalt.err (!%p572_p3)
}
  0x32   : > { %450 = dma.hbm_to_vmem [thread:$0]  (!%p757_p0), %s180_s3, 32, %s183_s8, %s170_s15  }
  0x33   : > { %191 = sbr.rel (%p775_p5) target bundleno = 150 (0x96), region = 28  ;;  %s791_s25 = sand.u32 (!%p775_p5), 1, %s644_s10  }
  0x34   : > { %s427_s18 = sshll.u32 (!%p775_p5), %s791_s25, 3  ;;  %s194_s19 = scalar_lea.sflag (!%p775_p5), [#allocation3], %s791_s25 }
  0x35   : > { %s197_s20 = scalar_lea.vmem (!%p775_p5), [#allocation2], %s427_s18 }
  0x38   : > { %627 = dma.done.wait (%p730_p8), %s194_s19, 128  }
  0x39   : > { %629 = vsyncadd (%p730_p8), %s194_s19, 4294967168  ;;  %s428_s5 = sshll.u32 %s791_s25, 1  ;;  %s203_s26 = scalar_lea.sflag [#allocation6], %s791_s25 }
  0x3a   : > { %s206_s27 = scalar_lea.vmem [#allocation5], %s428_s5 }
  0x3b   : > { %631 = dma.done.wait (%p730_p8), %s203_s26, 32  }
  0x3c   : > { %633 = vsyncadd (%p730_p8), %s203_s26, 4294967264  ;;  %s805_s28 = scalar_lea.vmem [#allocation7], %s427_s18  ;;  %v666_v0 = vmov 0.0   ;;  %v240_v1 = vld [vmem:[%s197_s20] sm:$0x3]  ;;  %s434_s29 = sshll.u32 %s652_s12, 7 }
  0x3d   : > { %238 = vst [vmem:[%s805_s28] sm:$0xff] %v666_v0  ;;  %v430_v2 = vld [vmem:[%s197_s20 + $0x2] sm:$0x3]  ;;  %v431_v4 = vld [vmem:[%s197_s20 + $0x4] sm:$0x3]  ;;  %v432_v5 = vld [vmem:[%s197_s20 + $0x6] sm:$0x3]  ;;  %s305_s8 = scalar_lea.hbm %s861_s2, %s434_s29 }
  0x3e   : > { %v243_v3 = vmax.f32 %v240_v1, %v430_v2  ;;  %v239_v19 = vld [vmem:[%s206_s27] sm:$0x3]  ;;  %s307_s21 = sshll.u32 %s805_s28, 4  ;;  %s293_s15 = scalar_lea.sflag [#allocation4], %s791_s25  ;;  %s813_s21 = int_to_ptr.vmem [resolvable:$true] %s307_s21 }
  0x3f   : > { %vm254_vm0 = vcmp.eq.s32.totalorder %v239_v19, 0  ;;  %vm261_vm1 = vcmp.eq.s32.totalorder %v239_v19, 1  ;;  %vm268_vm2 = vcmp.eq.s32.totalorder %v239_v19, 2  ;;  %vm275_vm3 = vcmp.eq.s32.totalorder %v239_v19, 3  ;;  %s576_s16 = scalar_lea.vmem %s813_s21, 128  ;;  %s667_s30 = smov [#allocation7]  }
  0x40   : > { %v246_v6 = vmax.f32 %v243_v3, %v431_v4  ;;  %v255_v24 = vsel %vm254_vm0, %v240_v1, 0.0  ;;  %v256_v33 = vsel %vm254_vm0, 0.1, %v666_v0  ;;  %p577_p8 = scmp.ne.s32.totalorder %s813_s21, %s576_s16  ;;  %s580_s12 = sshll.u32 %s667_s30, 4  ;;  %s581_s12 = int_to_ptr.vmem [resolvable:$false] %s580_s12 }
  0x41   : > { %v262_v25 = vsel %vm261_vm1, %v430_v2, %v255_v24  ;;  %v263_v34 = vsel %vm261_vm1, 0.2, %v256_v33  ;;  %s582_s4 = scalar_lea.vmem %s581_s12, 256  ;;  %p583_p5 = scmp.lt.s32.totalorder %s813_s21, %s581_s12 }
  0x42   : > { %v249_v7 = vmax.f32 %v246_v6, %v432_v5  ;;  %v269_v26 = vsel %vm268_vm2, %v431_v4, %v262_v25  ;;  %v270_v35 = vsel %vm268_vm2, 0.3, %v263_v34  ;;  %p578_p0 = pnand %p577_p8, %p734_p9  ;;  %p584_p6 = scmp.lt.s32.totalorder %s582_s4, %s576_s16 }
  0x43   : > { %v276_v27 = vsel %vm275_vm3, %v432_v5, %v269_v26  ;;  %v277_v36 = vsel %vm275_vm3, 0.4, %v270_v35 }
  0x44   : > { %v250_v8 = vsub.f32 %v240_v1, %v249_v7  ;;  %v257_v9 = vsub.f32 %v430_v2, %v249_v7  ;;  %v264_v10 = vsub.f32 %v431_v4, %v249_v7  ;;  %v271_v11 = vsub.f32 %v432_v5, %v249_v7  ;;  %v289_v42 = vld [vmem:[%s805_s28] sm:$0x3]  ;;  %p579_p2 = pneg %p578_p0  ;;  %p585_p4 = por %p584_p6, %p583_p5 }
  0x45   : > { %v278_v28 = vsub.f32 %v276_v27, %v249_v7 }
  0x46   : > { %v251_v12 = vmul.f32 1.442695, %v250_v8  ;;  %v258_v13 = vmul.f32 1.442695, %v257_v9  ;;  %v265_v14 = vmul.f32 1.442695, %v264_v10  ;;  %p586_p7 = pnand %p585_p4, %p579_p2 }
  0x47   : > { %v272_v15 = vmul.f32 1.442695, %v271_v11 }
  0x48   : > { %508 = vpow2.f32 %v251_v12 }
  0x49   : > { %510 = vpow2.f32 %v258_v13 }
  0x4a   : > { %512 = vpow2.f32 %v265_v14 }
  0x4b   : > { %514 = vpow2.f32 %v272_v15 }
  0x55   : > { %v509_v16 = vpop.eup %508 }
  0x56   : > { %v511_v17 = vpop.eup %510 }
  0x57   : > { %v513_v18 = vpop.eup %512  ;;  %v260_v20 = vadd.f32 %v511_v17, %v509_v16 }
  0x58   : > { %v515_v21 = vpop.eup %514 }
  0x59   : > { %v267_v22 = vadd.f32 %v513_v18, %v260_v20 }
  0x5b   : > { %v274_v23 = vadd.f32 %v515_v21, %v267_v22 }
  0x5d   : > { %516 = vlog2.f32 %v274_v23 }
  0x6a   : > { %v517_v29 = vpop.eup %516 }
  0x6b   : > { %v280_v30 = vmul.f32 0.6931472, %v517_v29 }
  0x6d   : > { %v281_v31 = vsub.f32 %v278_v28, %v280_v30 }
  0x6f   : > { %v282_v32 = vmul.f32 1.442695, %v281_v31  ;;  %v284_v38 = vmul.f32 %v281_v31, %v277_v36 }
  0x71   : > { %518 = vpow2.f32 %v282_v32 }
  0x7e   : > { %v519_v37 = vpop.eup %518 }
  0x7f   : > { %v285_v39 = vsub.f32 1.0, %v519_v37 }
  0x81   : > { %v286_v40 = vmul.f32 %v285_v39, %v285_v39 }
  0x83   : > { %v287_v41 = vmul.f32 %v286_v40, %v284_v38 }
  0x85   : > { %v288_v43 = vsub.f32 0.0, %v287_v41 }
  0x87   : > { %v290_v44 = vadd.f32 %v289_v42, %v288_v43 }
  0x89   : > { %291 = vst [vmem:[%s805_s28] sm:$0x3] %v290_v44 }
  0x8a   : > { %589 = shalt.err (!%p586_p7)
}
  0x8b   : > { %s590_s6 = scalar_lea.hbm %s305_s8, 128  ;;  %s594_s19 = scalar_lea.hbm %s861_s2, 256 }
  0x8c   : > { %p591_p1 = scmp.ne.s32.totalorder %s305_s8, %s590_s6  ;;  %p595_p3 = scmp.lt.s32.totalorder %s305_s8, %s861_s2 }
  0x8d   : > { %p596_p8 = scmp.lt.s32.totalorder %s594_s19, %s590_s6 }
  0x8e   : > { %p592_p10 = pnand %p591_p1, %p734_p9 }
  0x8f   : > { %p597_p0 = por %p596_p8, %p595_p3 }
  0x90   : > { %p593_p13 = pneg %p592_p10 }
  0x92   : > { %p598_p12 = pnand %p597_p0, %p593_p13 }
  0x94   : > { %601 = shalt.err (!%p598_p12)
}
  0x95   : > { %442 = dma.vmem_to_hbm [thread:$0]  (%p734_p9), %s813_s21, 128, %s305_s8, %s293_s15  }
  0x96 PF: > { %s319_s26 = sand.u32 1, %s640_s9   ;;  %p868_p2 = scmp.ge.s32.totalorder %s660_s14, 2 }
  0x97   : > { %s320_s27 = scalar_lea.sflag [#allocation4], %s319_s26 }
  0x98   : > { %p452_p5 = pnand %p868_p2, %p741_p11 }
  0x9a   : > { %p453_p6 = pneg %p452_p5 }
  0x9c   : > { %635 = dma.done.wait (%p453_p6), %s320_s27, 128  }
  0x9d   : > { %637 = vsyncadd (%p453_p6), %s320_s27, 4294967168  ;;  %s21_s14 = sadd.s32 1, %s660_s14   ;;  %s869_s9 = smov %s644_s10 }
  0x9e   : > { %p18_p4 = scmp.ge.s32.totalorder %s21_s14, 4   ;;  %s870_s10 = smov %s648_s11 }
  0x9f   : > { %s871_s11 = smov %s739_s23  ;;  %s872_s12 = smov %s656_s13 }
  0xa0   : > { %s873_s13 = smov %s875_s17  ;;  %20 = sbr.rel (!%p18_p4) target bundleno = 8 (0x8), region = 93 }
  0xa5   :  { %325 = vsyncpa [#allocation3], 1 }
  0xa6   :  { %327 = vsyncpa [#allocation3 + $0x1], 1 }
  0xa7   :  { %328 = vsyncpa [#allocation6], 1 }
  0xa8   :  { %330 = vsyncpa [#allocation6 + $0x1], 1 }
  0xa9   :  { %331 = vsyncpa [#allocation4], 1 }
  0xaa   :  { %333 = vsyncpa [#allocation4 + $0x1], 1 }

</bundles_post_ra>
